<compile_context>
chip_gen: v7x
topology: tpu7x:2x2x1
jax: 0.10.0
libtpu: 0.0.40
codegen_flags: <defaults>
</compile_context>

<pallas_src>
from functools import partial

import jax
import jax.numpy as jnp
from jax.experimental import pallas as pl
from jax.experimental.pallas import tpu as pltpu

_EPS = 1e-8


# --------------------------------------------------------------------------- #
# Shared per-tile math
# --------------------------------------------------------------------------- #
def _tile_stats(ys, yt, valid, *, class_axis, use_softmax, center_inter, eps):
    """Per-tile statistics for the DIST loss.

    ys / yt : f32 tiles; `class_axis` holds classes, every other axis samples.
    valid   : boolean mask over the sample axis (or None when the tile is full).
    Returns (inter_partial_sum [scalar], per-class moments (Ss,St,Sst,Sss,Stt)).
    """
    sample_axes = tuple(a for a in range(ys.ndim) if a != class_axis)
    c_dim = ys.shape[class_axis]

    if use_softmax:
        # Softmax over classes; the per-sample normalisation uses the EUP's
        # approximate reciprocal (free slot).  Pearson is per-sample
        # scale-invariant so the ~1e-4 relative error is harmless.
        ys = jnp.exp(ys - jnp.max(ys, axis=class_axis, keepdims=True))
        ys = ys * pl.reciprocal(jnp.sum(ys, axis=class_axis, keepdims=True), approx=True)
        yt = jnp.exp(yt - jnp.max(yt, axis=class_axis, keepdims=True))
        yt = yt * pl.reciprocal(jnp.sum(yt, axis=class_axis, keepdims=True), approx=True)

    if valid is not None:
        # Mask AFTER the softmax: padded samples hold unspecified data, but each
        # sample's softmax only mixes its own (fully valid or fully garbage)
        # class column, and this select drops the garbage before any reduction.
        ys = jnp.where(valid, ys, 0.0)
        yt = jnp.where(valid, yt, 0.0)

    def _both(p):
        # Reduce each product immediately on both axes so at most one full-tile
        # temporary (besides ys / yt) is live at a time.
        return (jnp.sum(p, axis=class_axis, keepdims=True),
                jnp.sum(p, axis=sample_axes, keepdims=True))

    r_st, c_st = _both(ys * yt)
    r_ss, c_ss = _both(ys * ys)
    r_tt, c_tt = _both(yt * yt)
    c_s = jnp.sum(ys, axis=sample_axes, keepdims=True)
    c_t = jnp.sum(yt, axis=sample_axes, keepdims=True)

    if use_softmax:
        # Softmax probabilities sum to 1 over classes -> skip two reductions.
        one = 1.0 if valid is None else valid.astype(jnp.float32)
        r_s = r_t = one
    else:
        r_s = jnp.sum(ys, axis=class_axis, keepdims=True)
        r_t = jnp.sum(yt, axis=class_axis, keepdims=True)

    # ---- inter-class relation: Pearson per sample over the class axis ----
    if center_inter:
        inv_c = 1.0 / c_dim
        num = r_st - r_s * r_t * inv_c
        vs = jnp.maximum(r_ss - r_s * r_s * inv_c, 0.0)   # clamp fp-negative variance
        vt = jnp.maximum(r_tt - r_t * r_t * inv_c, 0.0)
    else:                                                 # C == 1 -> plain cosine
        num, vs, vt = r_st, r_ss, r_tt
    corr = num * pl.reciprocal(jnp.sqrt(vs * vt) + eps, approx=True)
    if valid is not None:
        corr = jnp.where(valid, corr, 0.0)
    return jnp.sum(corr), (c_s, c_t, c_st, c_ss, c_tt)


def _pack_stats(parts, shape, axis):
    """Pack the six stat slabs into one dense block along `axis` using
    iota + select only (robust elementwise lowering, single unmasked store)."""
    idx = jax.lax.broadcasted_iota(jnp.int32, shape, axis)
    out = jnp.zeros(shape, jnp.float32)
    for k, p in enumerate(parts):
        out = jnp.where(idx == k, p, out)
    return out


# --------------------------------------------------------------------------- #
# Kernels (one per tile layout)
# --------------------------------------------------------------------------- #
def _dist_kernel_cs(ys_ref, yt_ref, o_ref,
                    inter_acc, s_acc, t_acc, st_acc, ss_acc, tt_acc,
                    *, n_lanes, use_softmax, center_inter, needs_mask, eps):
    """Class-on-sublane layout: tiles (b_blk, C, tile_s); grid (batch_blk, s_tile).

    The sample-tile axis (axis 1) is 'arbitrary': stats accumulate in VMEM
    scratch and a single (C, 8) block per batch block is written at the end."""
    s = pl.program_id(1)

    @pl.when(s == 0)
    def _():
        for acc in (inter_acc, s_acc, t_acc, st_acc, ss_acc, tt_acc):
            acc[...] = jnp.zeros_like(acc)

    ys = ys_ref[...].astype(jnp.float32)
    yt = yt_ref[...].astype(jnp.float32)
    tile_s = ys.shape[2]
    if needs_mask:
        lane = jax.lax.broadcasted_iota(jnp.int32, (1, 1, tile_s), 2)
        valid = (s * tile_s + lane) < n_lanes
    else:
        valid = None

    inter_sum, moments = _tile_stats(ys, yt, valid, class_axis=1,
                                     use_softmax=use_softmax,
                                     center_inter=center_inter, eps=eps)
    inter_acc[...] = inter_acc[...] + inter_sum
    for acc, m in zip((s_acc, t_acc, st_acc, ss_acc, tt_acc), moments):
        acc[...] += m.reshape(acc.shape)

    @pl.when(s == pl.num_programs(1) - 1)
    def _():
        o_ref[...] = _pack_stats(
            (s_acc[...], t_acc[...], st_acc[...], ss_acc[...], tt_acc[...],
             inter_acc[...]),
            o_ref.shape, 1)


def _dist_kernel_cl(ys_ref, yt_ref, o_ref,
                    inter_acc, s_acc, t_acc, st_acc, ss_acc, tt_acc,
                    *, n_rows, n_inner, use_softmax, center_inter, needs_mask, eps):
    """Class-on-lane layout (2-D inputs, large C): tiles (tile_n, C);
    grid (outer 'parallel', inner 'arbitrary'); one (8, C) block per outer step."""
    i = pl.program_id(1)

    @pl.when(i == 0)
    def _():
        for acc in (inter_acc, s_acc, t_acc, st_acc, ss_acc, tt_acc):
            acc[...] = jnp.zeros_like(acc)

    ys = ys_ref[...].astype(jnp.float32)
    yt = yt_ref[...].astype(jnp.float32)
    tile_n = ys.shape[0]
    if needs_mask:
        row = jax.lax.broadcasted_iota(jnp.int32, (tile_n, 1), 0)
        tile_idx = pl.program_id(0) * n_inner + i
        valid = (tile_idx * tile_n + row) < n_rows
    else:
        valid = None

    inter_sum, moments = _tile_stats(ys, yt, valid, class_axis=1,
                                     use_softmax=use_softmax,
                                     center_inter=center_inter, eps=eps)
    inter_acc[...] = inter_acc[...] + inter_sum
    for acc, m in zip((s_acc, t_acc, st_acc, ss_acc, tt_acc), moments):
        acc[...] += m.reshape(acc.shape)

    @pl.when(i == pl.num_programs(1) - 1)
    def _():
        o_ref[...] = _pack_stats(
            (s_acc[...], t_acc[...], st_acc[...], ss_acc[...], tt_acc[...],
             inter_acc[...]),
            o_ref.shape, 0)


# --------------------------------------------------------------------------- #
# Wrapper
# --------------------------------------------------------------------------- #
def _vmem_budget():
    """(vmem_limit_bytes, target_block_bytes) sized for the local TPU generation."""
    try:
        cap = int(pltpu.get_tpu_info().vmem_capacity_bytes)
    except Exception:
        cap = 64 * 1024 * 1024                     # conservative (v7x-sized) fallback
    limit = max(32 * 1024 * 1024, min(cap // 2, 64 * 1024 * 1024))
    # Smaller blocks on 64 MiB parts (v7x): 2 in x 2 buffers x block + ~3 live
    # f32 temporaries must sit comfortably under the scoped limit; 1 MiB blocks
    # are still at the measured HBM-roofline plateau.
    target = (1 if cap <= 64 * 1024 * 1024 else 2) * 1024 * 1024
    return limit, target


def _pick_tile(extent, unit_bytes, align, target_bytes):
    """Pick a tile along `extent`: the full extent if it fits the byte target,
    else the largest aligned tile that *divides* extent (no per-tile masking),
    else the largest aligned tile that fits (mask only the last tile)."""
    if extent * unit_bytes <= target_bytes or extent <= align:
        return extent
    max_tile = max(align, (target_bytes // max(1, unit_bytes)) // align * align)
    max_tile = min(max_tile, (extent // align) * align)
    floor = max(align, (max_tile // 2) // align * align)
    for tile in range(max_tile, floor - 1, -align):
        if extent % tile == 0:
            return tile
    return max_tile


def dist_loss(y_s, y_t, beta=1.0, gamma=1.0, *, block_bytes=None):
    """Pallas TPU implementation of DIST.forward; returns a scalar loss."""
    assert y_s.ndim in (2, 4) and y_s.shape == y_t.shape
    eps = _EPS
    vmem_limit, default_target = _vmem_budget()
    target = int(block_bytes) if block_bytes is not None else default_target
    itemsize = jnp.dtype(y_s.dtype).itemsize
    C = y_s.shape[1]
    use_softmax = (C != 1)
    center_inter = (C != 1)

    if y_s.ndim == 4:
        B = y_s.shape[0]
        hw = y_s.shape[2] * y_s.shape[3]
        # Free reshape (merges trailing contiguous dims) — no HBM transpose.
        ys_in = y_s.reshape(B, C, hw)
        yt_in = y_t.reshape(B, C, hw)
        use_cs = True
    elif C < 32:
        # Small-C 2-D inputs: with classes on the 128-lane axis only C/128 of the
        # VPU/EUP is used.  Relayout once (tiny XLA transpose) and reuse the
        # class-on-sublane kernel.  (On HBM-bound v5e this costs one extra pass
        # over a tiny tensor — acceptable.)
        B, hw = 1, y_s.shape[0]
        ys_in = y_s.T.reshape(1, C, hw)
        yt_in = y_t.T.reshape(1, C, hw)
        use_cs = True
    else:
        use_cs = False

    if use_cs:
        n_samples = B * hw
        bytes_per_image = C * hw * itemsize
        if bytes_per_image <= target:
            tile_s = hw
            # Block several batch elements per grid step when one image is small
            # (per-step overhead ~0.35 us would otherwise dominate).
            b_blk = 1
            cap = max(1, target // bytes_per_image)
            for d in range(min(B, cap), 0, -1):
                if B % d == 0:
                    b_blk = d
                    break
        else:
            b_blk = 1
            tile_s = _pick_tile(hw, itemsize * C, 128, target)
        s_tiles = pl.cdiv(hw, tile_s)
        n_bblk = B // b_blk
        needs_mask = (hw % tile_s) != 0
        kernel = partial(_dist_kernel_cs, n_lanes=hw,
                         use_softmax=use_softmax, center_inter=center_inter,
                         needs_mask=needs_mask, eps=eps)
        grid = (n_bblk, s_tiles)
        in_specs = [pl.BlockSpec((b_blk, C, tile_s), lambda b, s: (b, 0, s)),
                    pl.BlockSpec((b_blk, C, tile_s), lambda b, s: (b, 0, s))]
        out_shape = jax.ShapeDtypeStruct((n_bblk, C, 8), jnp.float32)
        out_specs = pl.BlockSpec((None, C, 8), lambda b, s: (b, 0, 0))
        scratch = [pltpu.VMEM((1, 1), jnp.float32)] + \
                  [pltpu.VMEM((C, 1), jnp.float32) for _ in range(5)]
        dim_sem = ("parallel", "arbitrary")
        # TODO(synk): when n_bblk == 1 the whole grid is serial on one v7x core;
        # a (2, s_tiles//2) split of the sample-tile axis would recover the 2nd TC.
    else:
        N = y_s.shape[0]
        n_samples = N
        ys_in, yt_in = y_s, y_t
        tile_n = _pick_tile(N, itemsize * C, 8, target)
        n_tiles = pl.cdiv(N, tile_n)
        # Split the tile axis so both v7x TensorCores get work (outer 'parallel').
        n_outer = 2 if (n_tiles >= 2 and n_tiles % 2 == 0) else 1
        n_inner = n_tiles // n_outer
        needs_mask = (N % tile_n) != 0
        kernel = partial(_dist_kernel_cl, n_rows=N, n_inner=n_inner,
                         use_softmax=use_softmax, center_inter=center_inter,
                         needs_mask=needs_mask, eps=eps)
        grid = (n_outer, n_inner)
        in_specs = [pl.BlockSpec((tile_n, C), lambda o, i: (o * n_inner + i, 0)),
                    pl.BlockSpec((tile_n, C), lambda o, i: (o * n_inner + i, 0))]
        out_shape = jax.ShapeDtypeStruct((n_outer, 8, C), jnp.float32)
        out_specs = pl.BlockSpec((None, 8, C), lambda o, i: (o, 0, 0))
        scratch = [pltpu.VMEM((1, 1), jnp.float32)] + \
                  [pltpu.VMEM((1, C), jnp.float32) for _ in range(5)]
        dim_sem = ("parallel", "arbitrary")

    n_el = ys_in.size
    cost = pl.CostEstimate(
        flops=int(22 * 2 * n_el),
        transcendentals=int(2 * n_el) if use_softmax else 0,
        bytes_accessed=int(2 * n_el * itemsize))

    packed = pl.pallas_call(
        kernel,
        out_shape=out_shape,
        grid=grid,
        in_specs=in_specs,
        out_specs=out_specs,
        scratch_shapes=scratch,
        compiler_params=pltpu.CompilerParams(
            dimension_semantics=dim_sem,
            vmem_limit_bytes=vmem_limit),
        cost_estimate=cost,
    )(ys_in, yt_in)

    # ---- tiny finalize (O(outer_blocks * C)) in plain JAX ----
    if use_cs:
        moments = jnp.sum(packed[:, :, :5], axis=0)            # (C, 5)
        inter_sum = jnp.sum(packed[:, 0, 5])
        col_s, col_t, col_st, col_ss, col_tt = (moments[:, k] for k in range(5))
    else:
        moments = jnp.sum(packed[:, :5, :], axis=0)            # (5, C)
        inter_sum = jnp.sum(packed[:, 5, 0])
        col_s, col_t, col_st, col_ss, col_tt = (moments[k, :] for k in range(5))

    inv_n = 1.0 / n_samples
    inter_loss = 1.0 - inter_sum * inv_n
    if n_samples != 1:          # Pearson over samples (cosine if a single sample)
        num = col_st - col_s * col_t * inv_n
        vs = jnp.maximum(col_ss - col_s * col_s * inv_n, 0.0)
        vt = jnp.maximum(col_tt - col_t * col_t * inv_n, 0.0)
    else:
        num, vs, vt = col_st, col_ss, col_tt
    intra_corr = num / (jnp.sqrt(vs) * jnp.sqrt(vt) + eps)
    intra_loss = 1.0 - jnp.mean(intra_corr)
    return beta * inter_loss + gamma * intra_loss


# --------------------------------------------------------------------------- #
# Pure-JAX transcription of the PyTorch module (self-check only)
# --------------------------------------------------------------------------- #
def _dist_reference(y_s, y_t, beta=1.0, gamma=1.0, eps=_EPS):
    C = y_s.shape[1]
    if y_s.ndim == 4:
        y_s = jnp.transpose(y_s, (0, 3, 2, 1)).reshape(-1, C)
        y_t = jnp.transpose(y_t, (0, 3, 2, 1)).reshape(-1, C)
    if C != 1:
        y_s = jax.nn.softmax(y_s, axis=1)
        y_t = jax.nn.softmax(y_t, axis=1)

    def cosine(x, y):
        nx = jnp.sqrt(jnp.sum(x * x, axis=1))
        ny = jnp.sqrt(jnp.sum(y * y, axis=1))
        return jnp.sum(x * y, axis=1) / (nx * ny + eps)

    def pearson(x, y):
        if x.shape[1] == 1:
            return cosine(x, y)
        return cosine(x - x.mean(1, keepdims=True), y - y.mean(1, keepdims=True))

    inter = 1.0 - pearson(y_s, y_t).mean()
    intra = 1.0 - pearson(y_s.T, y_t.T).mean()
    return beta * inter + gamma * intra


if __name__ == "__main__":
    key = jax.random.PRNGKey(0)
    ks = jax.random.split(key, 10)

    cases = [
        # 4-D, default blocks: one grid step, batch elements blocked together.
        (jax.random.normal(ks[0], (2, 4, 16, 16), jnp.float32),
         jax.random.normal(ks[1], (2, 4, 16, 16), jnp.float32), None),
        # 4-D, forced tiny blocks: multi-tile grid, masked last tile, scratch accumulation.
        (jax.random.normal(ks[2], (2, 4, 12, 12), jnp.float32),
         jax.random.normal(ks[3], (2, 4, 12, 12), jnp.float32), 2048),
        # 2-D, small C: relaid out to the class-on-sublane kernel.
        (jax.random.normal(ks[4], (50, 8), jnp.float32),
         jax.random.normal(ks[5], (50, 8), jnp.float32), 1024),
        # 2-D, large C: class-on-lane kernel with a (parallel, arbitrary) grid split.
        (jax.random.normal(ks[6], (64, 64), jnp.float32),
         jax.random.normal(ks[7], (64, 64), jnp.float32), 4096),
        # 2-D, large C with a partial (masked) last row tile.
        (jax.random.normal(ks[8], (50, 40), jnp.float32),
         jax.random.normal(ks[9], (50, 40), jnp.float32), 1280),
    ]

    ok = True
    for a, b, bb in cases:
        fn = jax.jit(dist_loss) if bb is None else jax.jit(partial(dist_loss, block_bytes=bb))
        got = fn(a, b)
        jax.block_until_ready(got)
        ref = _dist_reference(a, b)
        ok &= bool(got.shape == ()) and bool(jnp.isfinite(got))
        ok &= bool(jnp.allclose(got, ref, rtol=2e-3, atol=2e-3))
    assert ok, "DIST Pallas kernel does not match the reference"
    print("KERNEL_OK")
</pallas_src>

<mosaic_0001>
module attributes {stable_mosaic.version = 11 : i64} {
  func.func @_dist_kernel_cs(%arg0: i32, %arg1: i32, %arg2: memref<2x4x256xf32, #tpu.memory_space<vmem>>, %arg3: memref<2x4x256xf32, #tpu.memory_space<vmem>>, %arg4: memref<1x4x8xf32, #tpu.memory_space<vmem>>, %arg5: memref<1x1xf32, #tpu.memory_space<vmem>>, %arg6: memref<4x1xf32, #tpu.memory_space<vmem>>, %arg7: memref<4x1xf32, #tpu.memory_space<vmem>>, %arg8: memref<4x1xf32, #tpu.memory_space<vmem>>, %arg9: memref<4x1xf32, #tpu.memory_space<vmem>>, %arg10: memref<4x1xf32, #tpu.memory_space<vmem>>) attributes {dimension_semantics = [#tpu.dimension_semantics<parallel>, #tpu.dimension_semantics<arbitrary>], iteration_bounds = array<i64: 1, 1>, scalar_prefetch = 0 : i64, scratch_operands = 6 : i64, tpu.core_type = #tpu.core_type<tc>, window_params = [{transform_indices = @transform_0, window_bounds = array<i64: 2, 4, 256>}, {transform_indices = @transform_1, window_bounds = array<i64: 2, 4, 256>}, {transform_indices = @transform_2, window_bounds = array<i64: 1, 4, 8>}]} {
    %c0_i32 = arith.constant 0 : i32
    %0 = arith.cmpi eq, %arg1, %c0_i32 : i32
    %1 = arith.extui %0 : i1 to i32
    %c0_i32_0 = arith.constant 0 : i32
    %2 = arith.cmpi ne, %1, %c0_i32_0 : i32
    scf.if %2 {
      %cst_50 = arith.constant 0.000000e+00 : f32
      %91 = vector.broadcast %cst_50 : f32 to vector<1x1xf32>
      %c0_51 = arith.constant 0 : index
      %c0_52 = arith.constant 0 : index
      %92 = vector.load %arg5[%c0_51, %c0_52] : memref<1x1xf32, #tpu.memory_space<vmem>>, vector<1x1xf32>
      tpu.vector_store %arg5[%c0_51, %c0_52], %91 {strides = array<i32>} : memref<1x1xf32, #tpu.memory_space<vmem>>, vector<1x1xf32>,
      %cst_53 = arith.constant 0.000000e+00 : f32
      %93 = vector.broadcast %cst_53 : f32 to vector<4x1xf32>
      %c0_54 = arith.constant 0 : index
      %c0_55 = arith.constant 0 : index
      %94 = vector.load %arg6[%c0_54, %c0_55] : memref<4x1xf32, #tpu.memory_space<vmem>>, vector<4x1xf32>
      tpu.vector_store %arg6[%c0_54, %c0_55], %93 {strides = array<i32>} : memref<4x1xf32, #tpu.memory_space<vmem>>, vector<4x1xf32>,
      %cst_56 = arith.constant 0.000000e+00 : f32
      %95 = vector.broadcast %cst_56 : f32 to vector<4x1xf32>
      %c0_57 = arith.constant 0 : index
      %c0_58 = arith.constant 0 : index
      %96 = vector.load %arg7[%c0_57, %c0_58] : memref<4x1xf32, #tpu.memory_space<vmem>>, vector<4x1xf32>
      tpu.vector_store %arg7[%c0_57, %c0_58], %95 {strides = array<i32>} : memref<4x1xf32, #tpu.memory_space<vmem>>, vector<4x1xf32>,
      %cst_59 = arith.constant 0.000000e+00 : f32
      %97 = vector.broadcast %cst_59 : f32 to vector<4x1xf32>
      %c0_60 = arith.constant 0 : index
      %c0_61 = arith.constant 0 : index
      %98 = vector.load %arg8[%c0_60, %c0_61] : memref<4x1xf32, #tpu.memory_space<vmem>>, vector<4x1xf32>
      tpu.vector_store %arg8[%c0_60, %c0_61], %97 {strides = array<i32>} : memref<4x1xf32, #tpu.memory_space<vmem>>, vector<4x1xf32>,
      %cst_62 = arith.constant 0.000000e+00 : f32
      %99 = vector.broadcast %cst_62 : f32 to vector<4x1xf32>
      %c0_63 = arith.constant 0 : index
      %c0_64 = arith.constant 0 : index
      %100 = vector.load %arg9[%c0_63, %c0_64] : memref<4x1xf32, #tpu.memory_space<vmem>>, vector<4x1xf32>
      tpu.vector_store %arg9[%c0_63, %c0_64], %99 {strides = array<i32>} : memref<4x1xf32, #tpu.memory_space<vmem>>, vector<4x1xf32>,
      %cst_65 = arith.constant 0.000000e+00 : f32
      %101 = vector.broadcast %cst_65 : f32 to vector<4x1xf32>
      %c0_66 = arith.constant 0 : index
      %c0_67 = arith.constant 0 : index
      %102 = vector.load %arg10[%c0_66, %c0_67] : memref<4x1xf32, #tpu.memory_space<vmem>>, vector<4x1xf32>
      tpu.vector_store %arg10[%c0_66, %c0_67], %101 {strides = array<i32>} : memref<4x1xf32, #tpu.memory_space<vmem>>, vector<4x1xf32>,
    } else {
    }
    %c0 = arith.constant 0 : index
    %c0_1 = arith.constant 0 : index
    %c0_2 = arith.constant 0 : index
    %3 = vector.load %arg2[%c0, %c0_1, %c0_2] : memref<2x4x256xf32, #tpu.memory_space<vmem>>, vector<2x4x256xf32>
    %c0_3 = arith.constant 0 : index
    %c0_4 = arith.constant 0 : index
    %c0_5 = arith.constant 0 : index
    %4 = vector.load %arg3[%c0_3, %c0_4, %c0_5] : memref<2x4x256xf32, #tpu.memory_space<vmem>>, vector<2x4x256xf32>
    %cst = arith.constant dense<0xFF800000> : vector<2x256xf32>
    %5 = vector.multi_reduction <maximumf>, %3, %cst [1] : vector<2x4x256xf32> to vector<2x256xf32>
    %6 = vector.shape_cast %5 : vector<2x256xf32> to vector<2x1x256xf32>
    %7 = vector.broadcast %6 : vector<2x1x256xf32> to vector<2x4x256xf32>
    %8 = arith.subf %3, %7 : vector<2x4x256xf32>
    %9 = math.exp %8 : vector<2x4x256xf32>
    %cst_6 = arith.constant dense<0.000000e+00> : vector<2x256xf32>
    %10 = vector.multi_reduction <add>, %9, %cst_6 [1] : vector<2x4x256xf32> to vector<2x256xf32>
    %11 = vector.shape_cast %10 : vector<2x256xf32> to vector<2x1x256xf32>
    %12 = tpu.reciprocal %11 {approx = true} : vector<2x1x256xf32> -> vector<2x1x256xf32>
    %13 = vector.broadcast %12 : vector<2x1x256xf32> to vector<2x4x256xf32>
    %14 = arith.mulf %9, %13 : vector<2x4x256xf32>
    %cst_7 = arith.constant dense<0xFF800000> : vector<2x256xf32>
    %15 = vector.multi_reduction <maximumf>, %4, %cst_7 [1] : vector<2x4x256xf32> to vector<2x256xf32>
    %16 = vector.shape_cast %15 : vector<2x256xf32> to vector<2x1x256xf32>
    %17 = vector.broadcast %16 : vector<2x1x256xf32> to vector<2x4x256xf32>
    %18 = arith.subf %4, %17 : vector<2x4x256xf32>
    %19 = math.exp %18 : vector<2x4x256xf32>
    %cst_8 = arith.constant dense<0.000000e+00> : vector<2x256xf32>
    %20 = vector.multi_reduction <add>, %19, %cst_8 [1] : vector<2x4x256xf32> to vector<2x256xf32>
    %21 = vector.shape_cast %20 : vector<2x256xf32> to vector<2x1x256xf32>
    %22 = tpu.reciprocal %21 {approx = true} : vector<2x1x256xf32> -> vector<2x1x256xf32>
    %23 = vector.broadcast %22 : vector<2x1x256xf32> to vector<2x4x256xf32>
    %24 = arith.mulf %19, %23 : vector<2x4x256xf32>
    %25 = arith.mulf %14, %24 : vector<2x4x256xf32>
    %cst_9 = arith.constant dense<0.000000e+00> : vector<2x256xf32>
    %26 = vector.multi_reduction <add>, %25, %cst_9 [1] : vector<2x4x256xf32> to vector<2x256xf32>
    %27 = vector.shape_cast %26 : vector<2x256xf32> to vector<2x1x256xf32>
    %cst_10 = arith.constant dense<0.000000e+00> : vector<4xf32>
    %28 = vector.multi_reduction <add>, %25, %cst_10 [0, 2] : vector<2x4x256xf32> to vector<4xf32>
    %29 = vector.shape_cast %28 : vector<4xf32> to vector<1x4x1xf32>
    %30 = arith.mulf %14, %14 : vector<2x4x256xf32>
    %cst_11 = arith.constant dense<0.000000e+00> : vector<2x256xf32>
    %31 = vector.multi_reduction <add>, %30, %cst_11 [1] : vector<2x4x256xf32> to vector<2x256xf32>
    %32 = vector.shape_cast %31 : vector<2x256xf32> to vector<2x1x256xf32>
    %cst_12 = arith.constant dense<0.000000e+00> : vector<4xf32>
    %33 = vector.multi_reduction <add>, %30, %cst_12 [0, 2] : vector<2x4x256xf32> to vector<4xf32>
    %34 = vector.shape_cast %33 : vector<4xf32> to vector<1x4x1xf32>
    %35 = arith.mulf %24, %24 : vector<2x4x256xf32>
    %cst_13 = arith.constant dense<0.000000e+00> : vector<2x256xf32>
    %36 = vector.multi_reduction <add>, %35, %cst_13 [1] : vector<2x4x256xf32> to vector<2x256xf32>
    %37 = vector.shape_cast %36 : vector<2x256xf32> to vector<2x1x256xf32>
    %cst_14 = arith.constant dense<0.000000e+00> : vector<4xf32>
    %38 = vector.multi_reduction <add>, %35, %cst_14 [0, 2] : vector<2x4x256xf32> to vector<4xf32>
    %39 = vector.shape_cast %38 : vector<4xf32> to vector<1x4x1xf32>
    %cst_15 = arith.constant dense<0.000000e+00> : vector<4xf32>
    %40 = vector.multi_reduction <add>, %14, %cst_15 [0, 2] : vector<2x4x256xf32> to vector<4xf32>
    %41 = vector.shape_cast %40 : vector<4xf32> to vector<1x4x1xf32>
    %cst_16 = arith.constant dense<0.000000e+00> : vector<4xf32>
    %42 = vector.multi_reduction <add>, %24, %cst_16 [0, 2] : vector<2x4x256xf32> to vector<4xf32>
    %43 = vector.shape_cast %42 : vector<4xf32> to vector<1x4x1xf32>
    %cst_17 = arith.constant 2.500000e-01 : f32
    %44 = vector.broadcast %cst_17 : f32 to vector<2x1x256xf32>
    %45 = arith.subf %27, %44 : vector<2x1x256xf32>
    %cst_18 = arith.constant 2.500000e-01 : f32
    %46 = vector.broadcast %cst_18 : f32 to vector<2x1x256xf32>
    %47 = arith.subf %32, %46 : vector<2x1x256xf32>
    %cst_19 = arith.constant 0.000000e+00 : f32
    %48 = vector.broadcast %cst_19 : f32 to vector<2x1x256xf32>
    %49 = arith.maximumf %47, %48 : vector<2x1x256xf32>
    %cst_20 = arith.constant 2.500000e-01 : f32
    %50 = vector.broadcast %cst_20 : f32 to vector<2x1x256xf32>
    %51 = arith.subf %37, %50 : vector<2x1x256xf32>
    %cst_21 = arith.constant 0.000000e+00 : f32
    %52 = vector.broadcast %cst_21 : f32 to vector<2x1x256xf32>
    %53 = arith.maximumf %51, %52 : vector<2x1x256xf32>
    %54 = arith.mulf %49, %53 : vector<2x1x256xf32>
    %55 = math.sqrt %54 : vector<2x1x256xf32>
    %cst_22 = arith.constant 9.99999993E-9 : f32
    %56 = vector.broadcast %cst_22 : f32 to vector<2x1x256xf32>
    %57 = arith.addf %55, %56 : vector<2x1x256xf32>
    %58 = tpu.reciprocal %57 {approx = true} : vector<2x1x256xf32> -> vector<2x1x256xf32>
    %59 = arith.mulf %45, %58 : vector<2x1x256xf32>
    %60 = vector.shape_cast %59 : vector<2x1x256xf32> to vector<1x2x1x256xf32>
    %cst_23 = arith.constant dense<0.000000e+00> : vector<1xf32>
    %61 = vector.multi_reduction <add>, %60, %cst_23 [1, 2, 3] : vector<1x2x1x256xf32> to vector<1xf32>
    %62 = vector.shape_cast %61 : vector<1xf32> to vector<1x1x1x1xf32>
    %63 = vector.extract %62[0, 0, 0, 0] : f32 from vector<1x1x1x1xf32>
    %c0_24 = arith.constant 0 : index
    %c0_25 = arith.constant 0 : index
    %64 = vector.load %arg5[%c0_24, %c0_25] : memref<1x1xf32, #tpu.memory_space<vmem>>, vector<1x1xf32>
    %65 = vector.broadcast %63 : f32 to vector<1x1xf32>
    %66 = arith.addf %64, %65 : vector<1x1xf32>
    %c0_26 = arith.constant 0 : index
    %c0_27 = arith.constant 0 : index
    %67 = vector.load %arg5[%c0_26, %c0_27] : memref<1x1xf32, #tpu.memory_space<vmem>>, vector<1x1xf32>
    tpu.vector_store %arg5[%c0_26, %c0_27], %66 {strides = array<i32>} : memref<1x1xf32, #tpu.memory_space<vmem>>, vector<1x1xf32>,
    %c0_28 = arith.constant 0 : index
    %c0_29 = arith.constant 0 : index
    %68 = vector.load %arg6[%c0_28, %c0_29] : memref<4x1xf32, #tpu.memory_space<vmem>>, vector<4x1xf32>
    %69 = vector.shape_cast %41 : vector<1x4x1xf32> to vector<4x1xf32>
    %70 = arith.addf %68, %69 : vector<4x1xf32>
    %c0_30 = arith.constant 0 : index
    %c0_31 = arith.constant 0 : index
    %71 = vector.load %arg6[%c0_30, %c0_31] : memref<4x1xf32, #tpu.memory_space<vmem>>, vector<4x1xf32>
    tpu.vector_store %arg6[%c0_30, %c0_31], %70 {strides = array<i32>} : memref<4x1xf32, #tpu.memory_space<vmem>>, vector<4x1xf32>,
    %c0_32 = arith.constant 0 : index
    %c0_33 = arith.constant 0 : index
    %72 = vector.load %arg7[%c0_32, %c0_33] : memref<4x1xf32, #tpu.memory_space<vmem>>, vector<4x1xf32>
    %73 = vector.shape_cast %43 : vector<1x4x1xf32> to vector<4x1xf32>
    %74 = arith.addf %72, %73 : vector<4x1xf32>
    %c0_34 = arith.constant 0 : index
    %c0_35 = arith.constant 0 : index
    %75 = vector.load %arg7[%c0_34, %c0_35] : memref<4x1xf32, #tpu.memory_space<vmem>>, vector<4x1xf32>
    tpu.vector_store %arg7[%c0_34, %c0_35], %74 {strides = array<i32>} : memref<4x1xf32, #tpu.memory_space<vmem>>, vector<4x1xf32>,
    %c0_36 = arith.constant 0 : index
    %c0_37 = arith.constant 0 : index
    %76 = vector.load %arg8[%c0_36, %c0_37] : memref<4x1xf32, #tpu.memory_space<vmem>>, vector<4x1xf32>
    %77 = vector.shape_cast %29 : vector<1x4x1xf32> to vector<4x1xf32>
    %78 = arith.addf %76, %77 : vector<4x1xf32>
    %c0_38 = arith.constant 0 : index
    %c0_39 = arith.constant 0 : index
    %79 = vector.load %arg8[%c0_38, %c0_39] : memref<4x1xf32, #tpu.memory_space<vmem>>, vector<4x1xf32>
    tpu.vector_store %arg8[%c0_38, %c0_39], %78 {strides = array<i32>} : memref<4x1xf32, #tpu.memory_space<vmem>>, vector<4x1xf32>,
    %c0_40 = arith.constant 0 : index
    %c0_41 = arith.constant 0 : index
    %80 = vector.load %arg9[%c0_40, %c0_41] : memref<4x1xf32, #tpu.memory_space<vmem>>, vector<4x1xf32>
    %81 = vector.shape_cast %34 : vector<1x4x1xf32> to vector<4x1xf32>
    %82 = arith.addf %80, %81 : vector<4x1xf32>
    %c0_42 = arith.constant 0 : index
    %c0_43 = arith.constant 0 : index
    %83 = vector.load %arg9[%c0_42, %c0_43] : memref<4x1xf32, #tpu.memory_space<vmem>>, vector<4x1xf32>
    tpu.vector_store %arg9[%c0_42, %c0_43], %82 {strides = array<i32>} : memref<4x1xf32, #tpu.memory_space<vmem>>, vector<4x1xf32>,
    %c0_44 = arith.constant 0 : index
    %c0_45 = arith.constant 0 : index
    %84 = vector.load %arg10[%c0_44, %c0_45] : memref<4x1xf32, #tpu.memory_space<vmem>>, vector<4x1xf32>
    %85 = vector.shape_cast %39 : vector<1x4x1xf32> to vector<4x1xf32>
    %86 = arith.addf %84, %85 : vector<4x1xf32>
    %c0_46 = arith.constant 0 : index
    %c0_47 = arith.constant 0 : index
    %87 = vector.load %arg10[%c0_46, %c0_47] : memref<4x1xf32, #tpu.memory_space<vmem>>, vector<4x1xf32>
    tpu.vector_store %arg10[%c0_46, %c0_47], %86 {strides = array<i32>} : memref<4x1xf32, #tpu.memory_space<vmem>>, vector<4x1xf32>,
    %c0_i32_48 = arith.constant 0 : i32
    %88 = arith.cmpi eq, %arg1, %c0_i32_48 : i32
    %89 = arith.extui %88 : i1 to i32
    %c0_i32_49 = arith.constant 0 : i32
    %90 = arith.cmpi ne, %89, %c0_i32_49 : i32
    scf.if %90 {
      %c0_50 = arith.constant 0 : index
      %c0_51 = arith.constant 0 : index
      %91 = vector.load %arg6[%c0_50, %c0_51] : memref<4x1xf32, #tpu.memory_space<vmem>>, vector<4x1xf32>
      %c0_52 = arith.constant 0 : index
      %c0_53 = arith.constant 0 : index
      %92 = vector.load %arg7[%c0_52, %c0_53] : memref<4x1xf32, #tpu.memory_space<vmem>>, vector<4x1xf32>
      %c0_54 = arith.constant 0 : index
      %c0_55 = arith.constant 0 : index
      %93 = vector.load %arg8[%c0_54, %c0_55] : memref<4x1xf32, #tpu.memory_space<vmem>>, vector<4x1xf32>
      %c0_56 = arith.constant 0 : index
      %c0_57 = arith.constant 0 : index
      %94 = vector.load %arg9[%c0_56, %c0_57] : memref<4x1xf32, #tpu.memory_space<vmem>>, vector<4x1xf32>
      %c0_58 = arith.constant 0 : index
      %c0_59 = arith.constant 0 : index
      %95 = vector.load %arg10[%c0_58, %c0_59] : memref<4x1xf32, #tpu.memory_space<vmem>>, vector<4x1xf32>
      %c0_60 = arith.constant 0 : index
      %c0_61 = arith.constant 0 : index
      %96 = vector.load %arg5[%c0_60, %c0_61] : memref<1x1xf32, #tpu.memory_space<vmem>>, vector<1x1xf32>
      %97 = tpu.iota {dimensions = array<i32: 1>} : vector<4x8xi32>
      %cst_62 = arith.constant 0.000000e+00 : f32
      %98 = vector.broadcast %cst_62 : f32 to vector<4x8xf32>
      %c0_i32_63 = arith.constant 0 : i32
      %99 = vector.broadcast %c0_i32_63 : i32 to vector<4x8xi32>
      %100 = arith.cmpi eq, %97, %99 : vector<4x8xi32>
      %101 = vector.shape_cast %91 : vector<4x1xf32> to vector<4x1xf32>
      %102 = vector.broadcast %101 : vector<4x1xf32> to vector<4x8xf32>
      %103 = arith.select %100, %102, %98 : vector<4x8xi1>, vector<4x8xf32>
      %c1_i32 = arith.constant 1 : i32
      %104 = vector.broadcast %c1_i32 : i32 to vector<4x8xi32>
      %105 = arith.cmpi eq, %97, %104 : vector<4x8xi32>
      %106 = vector.shape_cast %92 : vector<4x1xf32> to vector<4x1xf32>
      %107 = vector.broadcast %106 : vector<4x1xf32> to vector<4x8xf32>
      %108 = arith.select %105, %107, %103 : vector<4x8xi1>, vector<4x8xf32>
      %c2_i32 = arith.constant 2 : i32
      %109 = vector.broadcast %c2_i32 : i32 to vector<4x8xi32>
      %110 = arith.cmpi eq, %97, %109 : vector<4x8xi32>
      %111 = vector.shape_cast %93 : vector<4x1xf32> to vector<4x1xf32>
      %112 = vector.broadcast %111 : vector<4x1xf32> to vector<4x8xf32>
      %113 = arith.select %110, %112, %108 : vector<4x8xi1>, vector<4x8xf32>
      %c3_i32 = arith.constant 3 : i32
      %114 = vector.broadcast %c3_i32 : i32 to vector<4x8xi32>
      %115 = arith.cmpi eq, %97, %114 : vector<4x8xi32>
      %116 = vector.shape_cast %94 : vector<4x1xf32> to vector<4x1xf32>
      %117 = vector.broadcast %116 : vector<4x1xf32> to vector<4x8xf32>
      %118 = arith.select %115, %117, %113 : vector<4x8xi1>, vector<4x8xf32>
      %c4_i32 = arith.constant 4 : i32
      %119 = vector.broadcast %c4_i32 : i32 to vector<4x8xi32>
      %120 = arith.cmpi eq, %97, %119 : vector<4x8xi32>
      %121 = vector.shape_cast %95 : vector<4x1xf32> to vector<4x1xf32>
      %122 = vector.broadcast %121 : vector<4x1xf32> to vector<4x8xf32>
      %123 = arith.select %120, %122, %118 : vector<4x8xi1>, vector<4x8xf32>
      %c5_i32 = arith.constant 5 : i32
      %124 = vector.broadcast %c5_i32 : i32 to vector<4x8xi32>
      %125 = arith.cmpi eq, %97, %124 : vector<4x8xi32>
      %126 = vector.shape_cast %96 : vector<1x1xf32> to vector<1x1xf32>
      %127 = vector.broadcast %126 : vector<1x1xf32> to vector<4x8xf32>
      %128 = arith.select %125, %127, %123 : vector<4x8xi1>, vector<4x8xf32>
      %c0_64 = arith.constant 0 : index
      %c0_65 = arith.constant 0 : index
      %c0_66 = arith.constant 0 : index
      %129 = vector.load %arg4[%c0_64, %c0_65, %c0_66] : memref<1x4x8xf32, #tpu.memory_space<vmem>>, vector<1x4x8xf32>
      %130 = vector.shape_cast %129 : vector<1x4x8xf32> to vector<4x8xf32>
      %131 = vector.shape_cast %128 : vector<4x8xf32> to vector<1x4x8xf32>
      tpu.vector_store %arg4[%c0_64, %c0_65, %c0_66], %131 {strides = array<i32>} : memref<1x4x8xf32, #tpu.memory_space<vmem>>, vector<1x4x8xf32>,
    } else {
    }
    return
  }
  func.func @transform_0(%arg0: i32, %arg1: i32) -> (i32, i32, i32) {
    %c0_i32 = arith.constant 0 : i32
    %c0_i32_0 = arith.constant 0 : i32
    return %arg0, %c0_i32, %arg1 : i32, i32, i32
  }
  func.func @transform_1(%arg0: i32, %arg1: i32) -> (i32, i32, i32) {
    %c0_i32 = arith.constant 0 : i32
    %c0_i32_0 = arith.constant 0 : i32
    return %arg0, %c0_i32, %arg1 : i32, i32, i32
  }
  func.func @transform_2(%arg0: i32, %arg1: i32) -> (i32, i32, i32) {
    %c0_i32 = arith.constant 0 : i32
    %c0_i32_0 = arith.constant 0 : i32
    %c0_i32_1 = arith.constant 0 : i32
    return %arg0, %c0_i32, %c0_i32_0 : i32, i32, i32
  }
}

</mosaic_0001>

<bundles_post_ra>
// kernel: dist_loss.1
= control target key start
LH: loop header
LB: loop body
LE: loop exit
PB: predicated region body
PF: predicated region fallthrough
CT: control target
= control target key end

     0   :  { %vm33_vm0 = vcmask 1043456   ;;  %vm437_vm9 = vcmask 1040384   ;;  %vm17_vm10 = vcmask 3072   ;;  %vm15_vm11 = vcmask 0   ;;  %s802_s0 = inlined_call_operand.vmem [shape: f32[2,4,256], index: 0, kind: input, shape index: {}]   ;;  %s803_s1 = inlined_call_operand.vmem [shape: f32[2,4,256], index: 1, kind: input, shape index: {}]   ;;  %s804_s2 = inlined_call_operand.vmem [shape: f32[1,4,8], index: 2, kind: output, shape index: {}]  }
   0x1   :  { %v621_v0 = vld [vmem:[%s802_s0] sm:$0xff]  ;;  %v626_v1 = vld [vmem:[%s802_s0 + $0x8] sm:$0xff] }
   0x2   :  { %v631_v2 = vld [vmem:[%s803_s1] sm:$0xff]  ;;  %v636_v3 = vld [vmem:[%s803_s1 + $0x8] sm:$0xff]  ;;  %v29_v4 = vcombine.high %v621_v0, %v621_v0  ;;  %v30_v5 = vcombine.high %v626_v1, %v626_v1  ;;  %v34_v6 = vsel %vm33_vm0, %v621_v0, -inf  ;;  %v48_v7 = vsel %vm33_vm0, %v626_v1, -inf }
   0x3   :  { %v35_v8 = vrot.slane %v34_v6, 4  ;;  %v49_v9 = vrot.slane %v48_v7, 4  ;;  %v126_v10 = vcombine.high %v631_v2, %v631_v2  ;;  %v127_v11 = vcombine.high %v636_v3, %v636_v3 }
   0x4   :  { %v41_v12 = vsel %vm33_vm0, %v29_v4, -inf  ;;  %v55_v13 = vsel %vm33_vm0, %v30_v5, -inf  ;;  %v130_v14 = vsel %vm33_vm0, %v631_v2, -inf  ;;  %v144_v15 = vsel %vm33_vm0, %v636_v3, -inf }
   0x5   :  { %v36_v16 = vmax.f32 %v34_v6, %v35_v8  ;;  %v42_v17 = vrot.slane %v41_v12, 4  ;;  %v50_v18 = vmax.f32 %v48_v7, %v49_v9  ;;  %v56_v19 = vrot.slane %v55_v13, 4 }
   0x6   :  { %v131_v20 = vrot.slane %v130_v14, 4  ;;  %v137_v21 = vsel %vm33_vm0, %v126_v10, -inf  ;;  %v145_v22 = vrot.slane %v144_v15, 4  ;;  %v151_v23 = vsel %vm33_vm0, %v127_v11, -inf }
   0x7   :  { %v37_v24 = vrot.slane %v36_v16, 2  ;;  %v43_v25 = vmax.f32 %v41_v12, %v42_v17  ;;  %v51_v26 = vrot.slane %v50_v18, 2  ;;  %v57_v27 = vmax.f32 %v55_v13, %v56_v19 }
   0x8   :  { %v132_v28 = vmax.f32 %v130_v14, %v131_v20  ;;  %v138_v29 = vrot.slane %v137_v21, 4  ;;  %v146_v30 = vmax.f32 %v144_v15, %v145_v22  ;;  %v152_v31 = vrot.slane %v151_v23, 4 }
   0x9   :  { %v38_v32 = vmax.f32 %v36_v16, %v37_v24  ;;  %v44_v33 = vrot.slane %v43_v25, 2  ;;  %v52_v34 = vmax.f32 %v50_v18, %v51_v26  ;;  %v58_v35 = vrot.slane %v57_v27, 2 }
   0xa   :  { %v133_v36 = vrot.slane %v132_v28, 2  ;;  %v139_v37 = vmax.f32 %v137_v21, %v138_v29  ;;  %v147_v38 = vrot.slane %v146_v30, 2  ;;  %v153_v39 = vmax.f32 %v151_v23, %v152_v31 }
   0xb   :  { %v39_v40 = vrot.slane %v38_v32, 1  ;;  %v45_v41 = vmax.f32 %v43_v25, %v44_v33  ;;  %v53_v42 = vrot.slane %v52_v34, 1  ;;  %v59_v43 = vmax.f32 %v57_v27, %v58_v35 }
   0xc   :  { %v134_v44 = vmax.f32 %v132_v28, %v133_v36  ;;  %v140_v45 = vrot.slane %v139_v37, 2  ;;  %v148_v46 = vmax.f32 %v146_v30, %v147_v38  ;;  %v154_v47 = vrot.slane %v153_v39, 2 }
   0xd   :  { %v40_v48 = vmax.f32 %v38_v32, %v39_v40  ;;  %v46_v49 = vrot.slane %v45_v41, 1  ;;  %v54_v50 = vmax.f32 %v52_v34, %v53_v42  ;;  %v60_v51 = vrot.slane %v59_v43, 1 }
   0xe   :  { %v135_v52 = vrot.slane %v134_v44, 1  ;;  %v141_v53 = vmax.f32 %v139_v37, %v140_v45  ;;  %v149_v54 = vrot.slane %v148_v46, 1  ;;  %v155_v55 = vmax.f32 %v153_v39, %v154_v47 }
   0xf   :  { %v47_v56 = vmax.f32 %v45_v41, %v46_v49  ;;  %v61_v57 = vmax.f32 %v59_v43, %v60_v51 }
  0x10   :  { %v136_v58 = vmax.f32 %v134_v44, %v135_v52  ;;  %v142_v59 = vrot.slane %v141_v53, 1  ;;  %v150_v60 = vmax.f32 %v148_v46, %v149_v54  ;;  %v156_v61 = vrot.slane %v155_v55, 1 }
  0x11   :  { %v66_v62 = vcombine.low %v40_v48, %v47_v56  ;;  %v67_v63 = vcombine.low %v54_v50, %v61_v57 }
  0x12   :  { %v143_v4 = vmax.f32 %v141_v53, %v142_v59  ;;  %v157_v5 = vmax.f32 %v155_v55, %v156_v61 }
  0x13   :  { %v70_v6 = vsub.f32 %v621_v0, %v66_v62  ;;  %v71_v7 = vsub.f32 %v626_v1, %v67_v63 }
  0x14   :  { %v162_v8 = vcombine.low %v136_v58, %v143_v4  ;;  %v163_v9 = vcombine.low %v150_v60, %v157_v5 }
  0x15   :  { %v72_v10 = vmul.f32 1.442695, %v70_v6  ;;  %v74_v11 = vmul.f32 1.442695, %v71_v7 }
  0x16   :  { %v166_v12 = vsub.f32 %v631_v2, %v162_v8  ;;  %v167_v13 = vsub.f32 %v636_v3, %v163_v9 }
  0x17   :  { %561 = vpow2.f32 %v72_v10 }
  0x18   :  { %563 = vpow2.f32 %v74_v11  ;;  %v168_v14 = vmul.f32 1.442695, %v166_v12  ;;  %v170_v15 = vmul.f32 1.442695, %v167_v13 }
  0x1a   :  { %565 = vpow2.f32 %v168_v14 }
  0x1b   :  { %567 = vpow2.f32 %v170_v15 }
  0x21   :  { %v662_v16 = vpop.eup %561 }
  0x22   :  { %v664_v17 = vpop.eup %563  ;;  %v78_v0 = vcombine.high %v662_v16, %v662_v16  ;;  %v82_v1 = vsel %vm33_vm0, %v662_v16, 0.0 }
  0x23   :  { %v79_v2 = vcombine.high %v664_v17, %v664_v17  ;;  %v83_v3 = vrot.slane %v82_v1, 4  ;;  %v96_v18 = vsel %vm33_vm0, %v664_v17, 0.0 }
  0x24   :  { %v674_v19 = vpop.eup %565  ;;  %v89_v20 = vsel %vm33_vm0, %v78_v0, 0.0  ;;  %v97_v21 = vrot.slane %v96_v18, 4 }
  0x25   :  { %v677_v22 = vpop.eup %567  ;;  %v84_v23 = vadd.f32 %v83_v3, %v82_v1  ;;  %v90_v24 = vrot.slane %v89_v20, 4  ;;  %v103_v25 = vsel %vm33_vm0, %v79_v2, 0.0  ;;  %v174_v26 = vcombine.high %v674_v19, %v674_v19 }
  0x26   :  { %v98_v27 = vadd.f32 %v97_v21, %v96_v18  ;;  %v104_v28 = vrot.slane %v103_v25, 4  ;;  %v175_v29 = vcombine.high %v677_v22, %v677_v22  ;;  %v178_v30 = vsel %vm33_vm0, %v674_v19, 0.0 }
  0x27   :  { %v85_v31 = vrot.slane %v84_v23, 2  ;;  %v91_v32 = vadd.f32 %v90_v24, %v89_v20  ;;  %v179_v33 = vrot.slane %v178_v30, 4  ;;  %v185_v34 = vsel %vm33_vm0, %v174_v26, 0.0 }
  0x28   :  { %v99_v35 = vrot.slane %v98_v27, 2  ;;  %v105_v36 = vadd.f32 %v104_v28, %v103_v25  ;;  %v186_v37 = vrot.slane %v185_v34, 4  ;;  %v192_v38 = vsel %vm33_vm0, %v677_v22, 0.0 }
  0x29   :  { %v86_v39 = vadd.f32 %v85_v31, %v84_v23  ;;  %v92_v40 = vrot.slane %v91_v32, 2  ;;  %v180_v41 = vadd.f32 %v179_v33, %v178_v30  ;;  %v193_v42 = vrot.slane %v192_v38, 4 }
  0x2a   :  { %v100_v43 = vadd.f32 %v99_v35, %v98_v27  ;;  %v106_v44 = vrot.slane %v105_v36, 2  ;;  %v187_v45 = vadd.f32 %v186_v37, %v185_v34  ;;  %v199_v46 = vsel %vm33_vm0, %v175_v29, 0.0 }
  0x2b   :  { %v87_v47 = vrot.slane %v86_v39, 1  ;;  %v93_v48 = vadd.f32 %v92_v40, %v91_v32  ;;  %v181_v49 = vrot.slane %v180_v41, 2  ;;  %v194_v50 = vadd.f32 %v193_v42, %v192_v38 }
  0x2c   :  { %v101_v51 = vrot.slane %v100_v43, 1  ;;  %v107_v52 = vadd.f32 %v106_v44, %v105_v36  ;;  %v188_v53 = vrot.slane %v187_v45, 2  ;;  %v200_v54 = vrot.slane %v199_v46, 4 }
  0x2d   :  { %v88_v55 = vadd.f32 %v87_v47, %v86_v39  ;;  %v94_v56 = vrot.slane %v93_v48, 1  ;;  %v182_v57 = vadd.f32 %v181_v49, %v180_v41  ;;  %v195_v58 = vrot.slane %v194_v50, 2 }
  0x2e   :  { %v102_v59 = vadd.f32 %v101_v51, %v100_v43  ;;  %v108_v60 = vrot.slane %v107_v52, 1  ;;  %v189_v61 = vadd.f32 %v188_v53, %v187_v45  ;;  %v201_v62 = vadd.f32 %v200_v54, %v199_v46 }
  0x2f   :  { %v95_v63 = vadd.f32 %v94_v56, %v93_v48  ;;  %569 = vrcp.f32 %v88_v55  ;;  %v183_v4 = vrot.slane %v182_v57, 1  ;;  %v196_v5 = vadd.f32 %v195_v58, %v194_v50 }
  0x30   :  { %v109_v6 = vadd.f32 %v108_v60, %v107_v52  ;;  %571 = vrcp.f32 %v102_v59  ;;  %v190_v7 = vrot.slane %v189_v61, 1  ;;  %v202_v8 = vrot.slane %v201_v62, 2 }
  0x31   :  { %573 = vrcp.f32 %v95_v63  ;;  %v197_v9 = vrot.slane %v196_v5, 1  ;;  %v184_v11 = vadd.f32 %v183_v4, %v182_v57 }
  0x32   :  { %575 = vrcp.f32 %v109_v6  ;;  %v203_v10 = vadd.f32 %v202_v8, %v201_v62  ;;  %v191_v12 = vadd.f32 %v190_v7, %v189_v61 }
  0x33   :  { %v198_v14 = vadd.f32 %v197_v9, %v196_v5  ;;  %577 = vrcp.f32 %v184_v11 }
  0x34   :  { %v204_v13 = vrot.slane %v203_v10, 1  ;;  %579 = vrcp.f32 %v191_v12 }
  0x35   :  { %581 = vrcp.f32 %v198_v14 }
  0x36   :  { %v205_v15 = vadd.f32 %v204_v13, %v203_v10 }
  0x38   :  { %583 = vrcp.f32 %v205_v15 }
  0x39   :  { %v570_v0 = vpop.eup %569 }
  0x3a   :  { %v572_v1 = vpop.eup %571 }
  0x3b   :  { %v574_v2 = vpop.eup %573 }
  0x3c   :  { %v576_v3 = vpop.eup %575  ;;  %v118_v18 = vcombine.low %v570_v0, %v574_v2 }
  0x3d   :  { %v119_v20 = vcombine.low %v572_v1, %v576_v3  ;;  %v578_v25 = vpop.eup %577 }
  0x3e   :  { %v691_v21 = vmul.f32 %v662_v16, %v118_v18  ;;  %v580_v27 = vpop.eup %579 }
  0x3f   :  { %v694_v23 = vmul.f32 %v664_v17, %v119_v20  ;;  %v582_v30 = vpop.eup %581  ;;  %v214_v34 = vcombine.low %v578_v25, %v580_v27 }
  0x40   :  { %v261_v24 = vmul.f32 %v691_v21, %v691_v21 }
  0x41   :  { %v262_v26 = vmul.f32 %v694_v23, %v694_v23  ;;  %v218_v43 = vmul.f32 %v674_v19, %v214_v34 }
  0x42   :  { %v265_v28 = vcombine.high %v261_v24, %v261_v24  ;;  %v701_v29 = vsel %vm33_vm0, %v261_v24, 0.0  ;;  %v584_v32 = vpop.eup %583 }
  0x43   :  { %v266_v31 = vcombine.high %v262_v26, %v262_v26  ;;  %v270_v16 = vrot.slane %v701_v29, 4  ;;  %v708_v33 = vsel %vm33_vm0, %v262_v26, 0.0  ;;  %v215_v39 = vcombine.low %v582_v30, %v584_v32 }
  0x44   :  { %v705_v17 = vsel %vm33_vm0, %v265_v28, 0.0  ;;  %v284_v37 = vrot.slane %v708_v33, 4  ;;  %v220_v50 = vmul.f32 %v218_v43, %v691_v21  ;;  %v302_v53 = vmul.f32 %v218_v43, %v218_v43 }
  0x45   :  { %v271_v35 = vadd.f32 %v270_v16, %v701_v29  ;;  %v277_v36 = vrot.slane %v705_v17, 4  ;;  %v714_v38 = vsel %vm33_vm0, %v266_v31, 0.0  ;;  %v219_v47 = vmul.f32 %v677_v22, %v215_v39 }
  0x46   :  { %v291_v40 = vrot.slane %v714_v38, 4  ;;  %v285_v42 = vadd.f32 %v284_v37, %v708_v33  ;;  %v224_v57 = vcombine.high %v220_v50, %v220_v50  ;;  %v306_v19 = vcombine.high %v302_v53, %v302_v53 }
  0x47   :  { %v278_v41 = vadd.f32 %v277_v36, %v705_v17  ;;  %v272_v44 = vrot.slane %v271_v35, 2  ;;  %v303_v56 = vmul.f32 %v219_v47, %v219_v47  ;;  %v724_v60 = vsel %vm33_vm0, %v220_v50, 0.0 }
  0x48   :  { %v292_v45 = vadd.f32 %v291_v40, %v714_v38  ;;  %v286_v48 = vrot.slane %v285_v42, 2  ;;  %v360_v22 = vcombine.high %v218_v43, %v218_v43  ;;  %v727_v4 = vsel %vm33_vm0, %v302_v53, 0.0 }
  0x49   :  { %v279_v46 = vrot.slane %v278_v41, 2  ;;  %v273_v51 = vadd.f32 %v272_v44, %v271_v35  ;;  %v307_v62 = vcombine.high %v303_v56, %v303_v56  ;;  %v730_v5 = vsel %vm33_vm0, %v306_v19, 0.0 }
  0x4a   :  { %v293_v49 = vrot.slane %v292_v45, 2  ;;  %v287_v54 = vadd.f32 %v286_v48, %v285_v42  ;;  %v733_v6 = vsel %vm33_vm0, %v303_v56, 0.0  ;;  %v221_v7 = vmul.f32 %v219_v47, %v694_v23 }
  0x4b   :  { %v280_v52 = vadd.f32 %v279_v46, %v278_v41  ;;  %v274_v58 = vrot.slane %v273_v51, 1  ;;  %v737_v8 = vsel %vm33_vm0, %v224_v57, 0.0  ;;  %v311_v9 = vrot.slane %v727_v4, 4 }
  0x4c   :  { %v294_v55 = vadd.f32 %v293_v49, %v292_v45  ;;  %v288_v61 = vrot.slane %v287_v54, 1  ;;  %v318_v10 = vrot.slane %v730_v5, 4  ;;  %v325_v13 = vrot.slane %v733_v6, 4 }
  0x4d   :  { %v281_v59 = vrot.slane %v280_v52, 1  ;;  %v275_v11 = vadd.f32 %v274_v58, %v273_v51  ;;  %v743_v14 = vsel %vm33_vm0, %v307_v62, 0.0  ;;  %v312_v0 = vadd.f32 %v311_v9, %v727_v4 }
  0x4e   :  { %v295_v63 = vrot.slane %v294_v55, 1  ;;  %v289_v15 = vadd.f32 %v288_v61, %v287_v54  ;;  %v319_v1 = vadd.f32 %v318_v10, %v730_v5  ;;  %v332_v2 = vrot.slane %v743_v14, 4 }
  0x4f   :  { %v282_v12 = vadd.f32 %v281_v59, %v280_v52  ;;  %v229_v3 = vrot.slane %v724_v60, 4  ;;  %v236_v18 = vrot.slane %v737_v8, 4  ;;  %v326_v24 = vadd.f32 %v325_v13, %v733_v6 }
  0x50   :  { %v296_v20 = vadd.f32 %v295_v63, %v294_v55  ;;  %v225_v25 = vcombine.high %v221_v7, %v221_v7  ;;  %v313_v26 = vrot.slane %v312_v0, 2  ;;  %v320_v27 = vrot.slane %v319_v1, 2 }
  0x51   :  { %v333_v28 = vadd.f32 %v332_v2, %v743_v14  ;;  %v242_v30 = vsel %vm33_vm0, %v221_v7, 0.0  ;;  %v327_v31 = vrot.slane %v326_v24, 2  ;;  %v542_v16 = vadd.f32 -0.25, %v275_v11 }
  0x52   :  { %v543_v32 = vadd.f32 -0.25, %v282_v12  ;;  %v314_v34 = vadd.f32 %v313_v26, %v312_v0  ;;  %v321_v35 = vadd.f32 %v320_v27, %v319_v1  ;;  %v544_v37 = vadd.f32 -0.25, %v289_v15 }
  0x53   :  { %v334_v36 = vrot.slane %v333_v28, 2  ;;  %v328_v39 = vadd.f32 %v327_v31, %v326_v24  ;;  %v545_v40 = vadd.f32 -0.25, %v296_v20  ;;  %v361_v41 = vcombine.high %v219_v47, %v219_v47 }
  0x54   :  { %v364_v42 = vsel %vm33_vm0, %v218_v43, 0.0  ;;  %v315_v44 = vrot.slane %v314_v34, 1  ;;  %v322_v45 = vrot.slane %v321_v35, 1  ;;  %v365_v48 = vsel %vm33_vm0, %v360_v22, 0.0 }
  0x55   :  { %v335_v46 = vadd.f32 %v334_v36, %v333_v28  ;;  %v329_v49 = vrot.slane %v328_v39, 1  ;;  %v366_v50 = vadd.f32 %v365_v48, %v364_v42  ;;  %v367_v51 = vsel %vm33_vm0, %v219_v47, 0.0 }
  0x56   :  { %v369_v52 = vsel %vm33_vm0, %v361_v41, 0.0  ;;  %v316_v53 = vadd.f32 %v315_v44, %v314_v34  ;;  %v323_v54 = vadd.f32 %v322_v45, %v321_v35  ;;  %v256_v56 = vadd.f32 %v737_v8, %v724_v60 }
  0x57   :  { %v336_v55 = vrot.slane %v335_v46, 1  ;;  %v330_v57 = vadd.f32 %v329_v49, %v328_v39  ;;  %v381_v58 = vmax.f32 %v542_v16, 0.0  ;;  %v382_v43 = vmax.f32 %v543_v32, 0.0 }
  0x58   :  { %v368_v59 = vadd.f32 %v367_v51, %v366_v50  ;;  %v546_v61 = vadd.f32 -0.25, %v316_v53  ;;  %v547_v62 = vadd.f32 -0.25, %v323_v54  ;;  %v257_v22 = vadd.f32 %v256_v56, %v242_v30 }
  0x59   :  { %v337_v19 = vadd.f32 %v336_v55, %v335_v46  ;;  %v249_v63 = vsel %vm33_vm0, %v225_v25, 0.0  ;;  %v383_v7 = vmax.f32 %v544_v37, 0.0  ;;  %v548_v47 = vadd.f32 -0.25, %v330_v57 }
  0x5a   :  { %v370_v9 = vadd.f32 %v369_v52, %v368_v59  ;;  %v384_v10 = vmax.f32 %v545_v40, 0.0  ;;  %v389_v12 = vmax.f32 %v546_v61, 0.0  ;;  %v390_v13 = vmax.f32 %v547_v62, 0.0 }
  0x5b   :  { %v549_v11 = vadd.f32 -0.25, %v337_v19  ;;  %v243_v15 = vrot.slane %v242_v30, 4  ;;  %v391_v0 = vmax.f32 %v548_v47, 0.0  ;;  %v258_v1 = vadd.f32 %v257_v22, %v249_v63 }
  0x5c   :  { %371 = vadd.xlane.f32.xlu1 %v370_v9  ;;  %v338_v2 = vadd.f32 %v730_v5, %v727_v4  ;;  %v393_v24 = vmul.f32 %v389_v12, %v381_v58  ;;  %v394_v26 = vmul.f32 %v390_v13, %v382_v43  ;;  %v230_v31 = vadd.f32 %v229_v3, %v724_v60 }
  0x5d   :  { %v392_v20 = vmax.f32 %v549_v11, 0.0  ;;  %v395_v27 = vmul.f32 %v391_v0, %v383_v7  ;;  %v237_v16 = vadd.f32 %v236_v18, %v737_v8  ;;  %v244_v32 = vadd.f32 %v243_v15, %v242_v30 }
  0x5e   :  { %585 = vrsqrt.f32 %v393_v24  ;;  %v339_v25 = vadd.f32 %v338_v2, %v733_v6  ;;  %v250_v34 = vrot.slane %v249_v63, 4  ;;  %v231_v5 = vrot.slane %v230_v31, 2 }
  0x5f   :  { %v396_v28 = vmul.f32 %v392_v20, %v384_v10  ;;  %587 = vrsqrt.f32 %v394_v26  ;;  %v238_v35 = vrot.slane %v237_v16, 2  ;;  %v245_v36 = vrot.slane %v244_v32, 2 }
  0x60   :  { %259 = vadd.xlane.f32.xlu1 %v258_v1  ;;  %589 = vrsqrt.f32 %v395_v27  ;;  %v340_v4 = vadd.f32 %v339_v25, %v743_v14  ;;  %v251_v37 = vadd.f32 %v250_v34, %v249_v63  ;;  %v232_v39 = vadd.f32 %v231_v5, %v230_v31 }
  0x61   :  { %591 = vrsqrt.f32 %v396_v28  ;;  %v239_v40 = vadd.f32 %v238_v35, %v237_v16  ;;  %v246_v6 = vadd.f32 %v245_v36, %v244_v32  ;;  %vm399_vm1 = vcmp.eq.f32.partialorder %v393_v24, inf }
  0x62   :  { %v252_v60 = vrot.slane %v251_v37, 2  ;;  %vm401_vm2 = vcmp.eq.f32.partialorder %v393_v24, 0.0  ;;  %v402_v8 = vand.u32 2147483648, %v393_v24  ;;  %vm406_vm3 = vcmp.eq.f32.partialorder %v394_v26, inf }
  0x63   :  { %vm408_vm4 = vcmp.eq.f32.partialorder %v394_v26, 0.0  ;;  %v409_v30 = vand.u32 2147483648, %v394_v26  ;;  %vm413_vm5 = vcmp.eq.f32.partialorder %v395_v27, inf  ;;  %vm415_vm6 = vcmp.eq.f32.partialorder %v395_v27, 0.0 }
  0x64   :  { %341 = vadd.xlane.f32.xlu1 %v340_v4  ;;  %v416_v44 = vand.u32 2147483648, %v395_v27  ;;  %vm420_vm7 = vcmp.eq.f32.partialorder %v396_v28, inf  ;;  %v423_v49 = vand.u32 2147483648, %v396_v28  ;;  %vm422_vm8 = vcmp.eq.f32.partialorder %v396_v28, 0.0 }
  0x65   :  { %v253_v53 = vadd.f32 %v252_v60, %v251_v37  ;;  %v233_v57 = vrot.slane %v232_v39, 1  ;;  %v240_v19 = vrot.slane %v239_v40, 1  ;;  %v247_v22 = vrot.slane %v246_v6, 1 }
  0x66   :  { %v345_v12 = vcombine.high %v691_v21, %v691_v21  ;;  %v349_v20 = vsel %vm33_vm0, %v691_v21, 0.0  ;;  %v346_v35 = vcombine.high %v694_v23, %v694_v23  ;;  %v352_v21 = vsel %vm33_vm0, %v694_v23, 0.0 }
  0x67   :  { %v254_v7 = vrot.slane %v253_v53, 1  ;;  %v234_v47 = vadd.f32 %v233_v57, %v232_v39  ;;  %v241_v9 = vadd.f32 %v240_v19, %v239_v40  ;;  %v248_v10 = vadd.f32 %v247_v22, %v246_v6 }
  0x68   :  { %v586_v41 = vpop.eup %585  ;;  %v354_v60 = vsel %vm33_vm0, %v346_v35, 0.0 }
  0x69   :  { %v588_v3 = vpop.eup %587  ;;  %v398_v18 = vmul.f32 %v586_v41, %v393_v24  ;;  %v255_v11 = vadd.f32 %v254_v7, %v253_v53  ;;  %v538_v13 = vadd.f32 -0.25, %v234_v47  ;;  %v539_v15 = vadd.f32 -0.25, %v241_v9 }
  0x6a   :  { %v590_v42 = vpop.eup %589  ;;  %v405_v14 = vmul.f32 %v588_v3, %v394_v26  ;;  %v540_v0 = vadd.f32 -0.25, %v248_v10  ;;  %v297_v41 = vadd.f32 %v705_v17, %v701_v29  ;;  %v602_v29 = vmov 0  }
  0x6b   :  { %v592_v45 = vpop.eup %591  ;;  %v400_v46 = vsel %vm399_vm1, %v393_v24, %v398_v18  ;;  %v412_v48 = vmul.f32 %v590_v42, %v395_v27  ;;  %v541_v2 = vadd.f32 -0.25, %v255_v11  ;;  %v350_v24 = vsel %vm33_vm0, %v345_v12, 0.0  ;;  %556 = vset.pattern.permute.xlu1 %v602_v29  ;;  %555 = vset.pattern.permute.xlu0 %v602_v29 }
  0x6c   :  { %v403_v50 = vsel %vm401_vm2, %v402_v8, %v400_v46  ;;  %v407_v51 = vsel %vm406_vm3, %v394_v26, %v405_v14  ;;  %v419_v52 = vmul.f32 %v592_v45, %v396_v28  ;;  %v351_v34 = vadd.f32 %v350_v24, %v349_v20 }
  0x6d   :  { %v410_v54 = vsel %vm408_vm4, %v409_v30, %v407_v51  ;;  %v414_v55 = vsel %vm413_vm5, %v395_v27, %v412_v48  ;;  %v425_v56 = vadd.f32 1e-08, %v403_v50  ;;  %v298_v18 = vadd.f32 %v297_v41, %v708_v33 }
  0x6e   :  { %v417_v58 = vsel %vm415_vm6, %v416_v44, %v414_v55  ;;  %v421_v43 = vsel %vm420_vm7, %v396_v28, %v419_v52  ;;  %v426_v59 = vadd.f32 1e-08, %v410_v54  ;;  %v353_v6 = vadd.f32 %v352_v21, %v351_v34 }
  0x6f   :  { %v424_v61 = vsel %vm422_vm8, %v423_v49, %v421_v43  ;;  %v427_v62 = vadd.f32 1e-08, %v417_v58  ;;  %593 = vrcp.f32 %v425_v56  ;;  %v299_v23 = vadd.f32 %v298_v18, %v714_v38 }
  0x70   :  { %v428_v63 = vadd.f32 1e-08, %v424_v61  ;;  %595 = vrcp.f32 %v426_v59  ;;  %v355_v3 = vadd.f32 %v354_v60, %v353_v6  ;;  %v601_v30 = vmov 0.0  }
  0x71   :  { %597 = vrcp.f32 %v427_v62  ;;  %19 = vst.msk [vmem:[#allocation4] sm:$0xf] %vm17_vm10, %v601_v30  ;;  %18 = vst.msk [vmem:[#allocation3] sm:$0xf] %vm17_vm10, %v601_v30  ;;  %v484_v12 = vlaneseq  ;;  %vm532_vm2 = vcmask 60416  }
  0x72   :  { %599 = vrcp.f32 %v428_v63  ;;  %20 = vst.msk [vmem:[#allocation5] sm:$0xf] %vm17_vm10, %v601_v30  ;;  %21 = vst.msk [vmem:[#allocation6] sm:$0xf] %vm17_vm10, %v601_v30 }
  0x73   :  { %22 = vst.msk [vmem:[#allocation7] sm:$0xf] %vm17_vm10, %v601_v30 }
  0x74   :  { %16 = vst.msk [vmem:[#allocation2] sm:$0x1] %vm15_vm11, %v601_v30 }
  0x78   :  { %v463_v17 = vld [vmem:[#allocation4] sm:$0xf]  ;;  %v459_v53 = vld [vmem:[#allocation3] sm:$0xf] }
  0x79   :  { %v594_v1 = vpop.eup %593  ;;  %v466_v42 = vld [vmem:[#allocation5] sm:$0xf]  ;;  %v469_v58 = vld [vmem:[#allocation6] sm:$0xf] }
  0x7a   :  { %v596_v26 = vpop.eup %595  ;;  %v433_v27 = vmul.f32 %v594_v1, %v538_v13  ;;  %v472_v45 = vld [vmem:[#allocation7] sm:$0xf] }
  0x7b   :  { %v598_v28 = vpop.eup %597  ;;  %v434_v25 = vmul.f32 %v596_v26, %v539_v15  ;;  %v454_v47 = vld [vmem:[#allocation2] sm:$0x1]  ;;  %v485_v15 = vand.u32 127, %v484_v12 }
  0x7c   :  { %v600_v31 = vpop.eup %599  ;;  %v435_v16 = vmul.f32 %v598_v28, %v540_v0  ;;  %v438_v32 = vsel %vm437_vm9, %v433_v27, 0.0 }
  0x7d   :  { %v436_v4 = vmul.f32 %v600_v31, %v541_v2  ;;  %v439_v5 = vsel %vm437_vm9, %v434_v25, 0.0  ;;  %vm486_vm12 = vcmp.eq.s32.totalorder %v485_v15, 0  ;;  %vm493_vm13 = vcmp.eq.s32.totalorder %v485_v15, 1 }
  0x7e   :  { %v440_v36 = vadd.f32 %v439_v5, %v438_v32  ;;  %v441_v37 = vsel %vm437_vm9, %v435_v16, 0.0  ;;  %vm500_vm14 = vcmp.eq.s32.totalorder %v485_v15, 2  ;;  %vm507_vm15 = vcmp.eq.s32.totalorder %v485_v15, 3 }
  0x7f   :  { %v443_v39 = vsel %vm437_vm9, %v436_v4, 0.0  ;;  %vm514_vm0 = vcmp.eq.s32.totalorder %v485_v15, 4  ;;  %vm521_vm1 = vcmp.eq.s32.totalorder %v485_v15, 5 }
  0x80   :  { %v442_v40 = vadd.f32 %v441_v37, %v440_v36 }
  0x82   :  { %v444_v8 = vadd.f32 %v443_v39, %v442_v40 }
  0x84   :  { %445 = vadd.xlane.f32.xlu0 %v444_v8 }
  0x88   :  { %356 = vadd.xlane.f32.xlu0 %v355_v3 }
  0x8c   :  { %300 = vadd.xlane.f32.xlu0 %v299_v23 }
  0xe9   :  { %v372_v33 = vpop.xlane.xlu1 %371 }
  0xea   :  { %v464_v38 = vadd.f32 %v463_v17, %v372_v33 }
  0xec   :  { %465 = vst.msk [vmem:[#allocation4] sm:$0xf] %vm17_vm10, %v464_v38 }
  0xed   :  { %v260_v14 = vpop.xlane.xlu1 %259 }
  0xee   :  { %v467_v44 = vadd.f32 %v466_v42, %v260_v14 }
  0xf0   :  { %468 = vst.msk [vmem:[#allocation5] sm:$0xf] %vm17_vm10, %v467_v44 }
  0xf1   :  { %v342_v46 = vpop.xlane.xlu1 %341 }
  0xf2   :  { %v473_v49 = vadd.f32 %v472_v45, %v342_v46 }
  0xf3   :  { %v479_v48 = vld [vmem:[#allocation4] sm:$0xf] }
  0xf4   :  { %496 = vperm.xlu1 %556, %v479_v48   ;;  %474 = vst.msk [vmem:[#allocation7] sm:$0xf] %vm17_vm10, %v473_v49 }
  0xf7   :  { %v480_v50 = vld [vmem:[#allocation5] sm:$0xf] }
  0xf8   :  { %503 = vperm.xlu1 %556, %v480_v50  }
  0xfb   :  { %v482_v7 = vld [vmem:[#allocation7] sm:$0xf] }
 0x111   :  { %v446_v51 = vpop.xlane.xlu0 %445 }
 0x112   :  { %v447_v52 = vrot.slane %v446_v51, 4 }
 0x114   :  { %v448_v54 = vadd.f32 %v447_v52, %v446_v51 }
 0x115   :  { %v357_v55 = vpop.xlane.xlu0 %356 }
 0x116   :  { %v449_v56 = vrot.slane %v448_v54, 2  ;;  %v460_v57 = vadd.f32 %v459_v53, %v357_v55 }
 0x118   :  { %v450_v43 = vadd.f32 %v449_v56, %v448_v54  ;;  %462 = vst.msk [vmem:[#allocation3] sm:$0xf] %vm17_vm10, %v460_v57 }
 0x119   :  { %v301_v59 = vpop.xlane.xlu0 %300 }
 0x11a   :  { %v451_v19 = vrot.slane %v450_v43, 1  ;;  %v470_v61 = vadd.f32 %v469_v58, %v301_v59 }
 0x11c   :  { %v452_v62 = vadd.f32 %v451_v19, %v450_v43  ;;  %471 = vst.msk [vmem:[#allocation6] sm:$0xf] %vm17_vm10, %v470_v61 }
 0x11e   :  { %551 = vpush %v452_v62 }
 0x11f   :  { %v478_v22 = vld [vmem:[#allocation3] sm:$0xf] }
 0x120   :  { %489 = vperm.xlu0 %555, %v478_v22  }
 0x123   :  { %v481_v63 = vld [vmem:[#allocation6] sm:$0xf] }
 0x124   :  { %510 = vperm.xlu1 %556, %v481_v63  }
 0x128   :  { %517 = vperm.xlu1 %556, %v482_v7  }
 0x14f   :  { %s552_s0 = spop %551 }
 0x150   :  { %v455_v9 = vstv %s552_s0 }
 0x151   :  { %v456_v10 = vadd.f32 %v455_v9, %v454_v47 }
 0x153   :  { %458 = vst.msk [vmem:[#allocation2] sm:$0x1] %vm15_vm11, %v456_v10 }
 0x15a   :  { %v550_v11 = vld [vmem:[#allocation2] ss:$0 sm:$0xff] }
 0x15b   :  { %528 = vperm.xlu1 %556, %v550_v11  }
 0x173   :  { %v497_v13 = vpop.permute.xlu1 %496 }
 0x177   :  { %v504_v0 = vpop.permute.xlu1 %503 }
 0x19f   :  { %v490_v1 = vpop.permute.xlu0 %489 }
 0x1a0   :  { %v492_v2 = vsel %vm486_vm12, %v490_v1, 0.0 }
 0x1a1   :  { %v499_v24 = vsel %vm493_vm13, %v497_v13, %v492_v2 }
 0x1a2   :  { %v506_v26 = vsel %vm500_vm14, %v504_v0, %v499_v24 }
 0x1a3   :  { %v511_v20 = vpop.permute.xlu1 %510 }
 0x1a4   :  { %v513_v28 = vsel %vm507_vm15, %v511_v20, %v506_v26 }
 0x1a7   :  { %v518_v27 = vpop.permute.xlu1 %517 }
 0x1a8   :  { %v520_v25 = vsel %vm514_vm0, %v518_v27, %v513_v28 }
 0x1da   :  { %v529_v31 = vpop.permute.xlu1 %528 }
 0x1db   :  { %v531_v16 = vsel %vm521_vm1, %v529_v31, %v520_v25 }
 0x1dc   :  { %533 = vst.msk [vmem:[%s804_s2] sm:$0xf] %vm532_vm2, %v531_v16 }

</bundles_post_ra>
